<compile_context>
chip_gen: v6e
topology: v6e:2x2x1
jax: 0.10.0
libtpu: 0.0.40
codegen_flags: <defaults>
</compile_context>

<pallas_src>
import functools
import math

import jax
import jax.numpy as jnp
from jax import lax
from jax.experimental import pallas as pl
from jax.experimental.pallas import tpu as pltpu


def _dwconv_kernel(H, W, x_ref, w_ref, b_ref, ml_ref, mr_ref, mt_ref, mb_ref, o_ref):
    """One channel-tile of the fused (H*W, B*C) depthwise 3x3 conv.

    x_ref:  (N, CT)  N = H*W flattened spatial (sublanes), CT fused channels (lanes)
    w_ref:  (9, CT)  w_ref[3*i + j] = weight[i, j, :] tiled across the batch
    b_ref:  (1, CT)  bias tiled across the batch
    m*_ref: (N, 1)   f32 edge-validity masks (left / right / top / bottom neighbour exists)
    o_ref:  (N, CT)
    """
    N, CT = o_ref.shape
    f32 = jnp.float32

    x = x_ref[...].astype(f32)
    w = w_ref[...].astype(f32)
    bias = b_ref[...].astype(f32)                      # (1, CT)
    m_l = ml_ref[...]                                  # (N, 1) f32 masks, precomputed
    m_r = mr_ref[...]
    m_t = mt_ref[...]
    m_b = mb_ref[...]

    aligned = (N % 8 == 0) and (CT % 128 == 0)

    def shift(v, k):
        # Cyclic shift along the flattened spatial axis: out[n] = v[(n - k) % N].
        k = k % N
        if k == 0:
            return v
        if aligned:
            return pltpu.roll(v, k, axis=0)            # sublane rotate on the XLU (co-issues with VPU)
        # Fallback for unaligned shapes (correct, just slower).
        return jnp.concatenate([v[N - k:], v[:N - k]], axis=0)

    # Horizontal neighbours: in the flattened layout the left/right pixel is a +-1 shift;
    # wrap-around across image-row boundaries lands exactly on the masked edge positions.
    x_l = shift(x, 1) * m_l                            # x[h, w-1]
    x_r = shift(x, N - 1) * m_r                        # x[h, w+1]

    def hsum(r):
        # Combine the 3 horizontal taps of kernel row r (0 = top, 1 = mid, 2 = bottom).
        return (x_l * w[3 * r:3 * r + 1]
                + x * w[3 * r + 1:3 * r + 2]
                + x_r * w[3 * r + 2:3 * r + 3])

    mid = hsum(1) + bias                               # centre row; bias folded in here
    top = shift(hsum(0), W) * m_t                      # contributions coming from row h-1
    bot = shift(hsum(2), N - W) * m_b                  # contributions coming from row h+1

    o_ref[...] = (mid + top + bot).astype(o_ref.dtype)


def _pick_channel_tile(bc, n_pixels, itemsize):
    """Largest lane-aligned channel tile that divides B*C, keeps the per-step block
    <= ~2 MiB (in+out double-buffered stays well inside the scoped-VMEM default on
    v5e/v6e/v7x) and, when possible, yields >=2 grid steps so both v7x TensorCores
    get work."""
    if bc % 128 != 0:
        return bc                                      # tiny-C fallback: single full-width block
    budget = 2 << 20
    cands = [ct for ct in range(128, bc + 1, 128)
             if bc % ct == 0 and n_pixels * ct * itemsize <= budget]
    if not cands:
        return 128
    multi = [ct for ct in cands if bc // ct >= 2]
    return max(multi) if multi else max(cands)


@jax.jit
def dwconv_pallas(x_nbc, weight_hwc, bias_c):
    """x_nbc: (N, B, C) -> (N, B, C), matching DWConv.forward."""
    N, B, C = x_nbc.shape
    H = W = int(math.isqrt(N))
    assert H * W == N, "sequence length must be a perfect square"
    BC = B * C
    itemsize = jnp.dtype(x_nbc.dtype).itemsize

    # Free view: row-major (N, B, C) == (H*W, B*C). No transpose, no pad, no extra HBM pass.
    x2 = x_nbc.reshape(N, BC)

    # Depthwise weight/bias replicated across the fused batch axis
    # (fused channel j = b*C + c uses weight[..., c]); only a few KiB.
    w9 = jnp.tile(weight_hwc.reshape(9, C), (1, B))    # (9, B*C)
    b2 = jnp.tile(bias_c.reshape(1, C), (1, B))        # (1, B*C)

    # Edge-validity masks over the flattened spatial axis, precomputed host-side as f32
    # so the kernel does pure broadcast multiplies (no int div/mod/compare on the VPU).
    lin = jnp.arange(N, dtype=jnp.int32)
    col = lin % W
    row = lin // W
    m_l = (col > 0).astype(jnp.float32).reshape(N, 1)        # has a left neighbour
    m_r = (col < W - 1).astype(jnp.float32).reshape(N, 1)    # has a right neighbour
    m_t = (row > 0).astype(jnp.float32).reshape(N, 1)        # has a top neighbour
    m_b = (row < H - 1).astype(jnp.float32).reshape(N, 1)    # has a bottom neighbour

    CT = _pick_channel_tile(BC, N, itemsize)

    cost = pl.CostEstimate(
        flops=22 * N * BC,                              # ~13 mul + 9 add per output element
        transcendentals=0,
        bytes_accessed=2 * N * BC * itemsize + 10 * BC * 4 + 4 * N * 4)

    out2 = pl.pallas_call(
        functools.partial(_dwconv_kernel, H, W),
        out_shape=jax.ShapeDtypeStruct((N, BC), x_nbc.dtype),
        grid_spec=pltpu.PrefetchScalarGridSpec(
            num_scalar_prefetch=0,
            grid=(BC // CT,),
            in_specs=[
                pl.BlockSpec((N, CT), lambda i: (0, i)),   # activations (lane-dense)
                pl.BlockSpec((9, CT), lambda i: (0, i)),   # weights
                pl.BlockSpec((1, CT), lambda i: (0, i)),   # bias
                pl.BlockSpec((N, 1), lambda i: (0, 0)),    # left mask   (DMA'd once)
                pl.BlockSpec((N, 1), lambda i: (0, 0)),    # right mask
                pl.BlockSpec((N, 1), lambda i: (0, 0)),    # top mask
                pl.BlockSpec((N, 1), lambda i: (0, 0)),    # bottom mask
            ],
            out_specs=pl.BlockSpec((N, CT), lambda i: (0, i)),
        ),
        compiler_params=pltpu.CompilerParams(
            dimension_semantics=("parallel",)),
        cost_estimate=cost,
    )(x2, w9, b2, m_l, m_r, m_t, m_b)

    return out2.reshape(N, B, C)


def dwconv_reference(x_nbc, weight_hwc, bias_c):
    """Pure-JAX reference (NCHW depthwise conv, mirrors the PyTorch module)."""
    N, B, C = x_nbc.shape
    H = W = int(math.isqrt(N))
    x = jnp.transpose(x_nbc, (1, 0, 2))                      # (B, N, C)
    x = jnp.transpose(x, (0, 2, 1)).reshape(B, C, H, W)      # (B, C, H, W)
    w = jnp.transpose(weight_hwc, (2, 0, 1))[:, None, :, :]  # (C, 1, 3, 3)
    y = lax.conv_general_dilated(
        x, w, window_strides=(1, 1), padding=((1, 1), (1, 1)),
        dimension_numbers=("NCHW", "OIHW", "NCHW"), feature_group_count=C)
    y = y + bias_c.reshape(1, C, 1, 1)
    y = y.reshape(B, C, N).transpose(0, 2, 1)                # (B, N, C)
    return jnp.transpose(y, (1, 0, 2))                       # (N, B, C)


if __name__ == "__main__":
    # Small shapes consistent with the forward: seq N=64 (H=W=8), batch B=2, dim C=128.
    N, B, C = 64, 2, 128
    key = jax.random.PRNGKey(0)
    kx, kw, kb = jax.random.split(key, 3)

    x = jax.random.normal(kx, (N, B, C), dtype=jnp.float32)
    # Deterministic synthetic params (shapes from nn.Conv2d(dim, dim, 3, groups=dim)).
    weight = jax.random.normal(kw, (3, 3, C), dtype=jnp.float32) * 0.1
    bias = jax.random.normal(kb, (C,), dtype=jnp.float32) * 0.1

    out = jax.block_until_ready(dwconv_pallas(x, weight, bias))
    ref = jax.block_until_ready(dwconv_reference(x, weight, bias))

    assert out.shape == (N, B, C)
    assert jnp.allclose(out, ref, atol=1e-4, rtol=1e-4), "mismatch vs reference"
    print("KERNEL_OK")
</pallas_src>

<mosaic_0001>
module attributes {stable_mosaic.version = 11 : i64} {
  func.func @_dwconv_kernel(%arg0: i32, %arg1: memref<64x128xf32, #tpu.memory_space<vmem>>, %arg2: memref<9x128xf32, #tpu.memory_space<vmem>>, %arg3: memref<1x128xf32, #tpu.memory_space<vmem>>, %arg4: memref<64x1xf32, #tpu.memory_space<vmem>>, %arg5: memref<64x1xf32, #tpu.memory_space<vmem>>, %arg6: memref<64x1xf32, #tpu.memory_space<vmem>>, %arg7: memref<64x1xf32, #tpu.memory_space<vmem>>, %arg8: memref<64x128xf32, #tpu.memory_space<vmem>>) attributes {dimension_semantics = [#tpu.dimension_semantics<parallel>], iteration_bounds = array<i64: 2>, scalar_prefetch = 0 : i64, scratch_operands = 0 : i64, tpu.core_type = #tpu.core_type<tc>, window_params = [{transform_indices = @transform_0, window_bounds = array<i64: 64, 128>}, {transform_indices = @transform_1, window_bounds = array<i64: 9, 128>}, {transform_indices = @transform_2, window_bounds = array<i64: 1, 128>}, {pipeline_mode = #tpu.pipeline_mode<synchronous>, transform_indices = @transform_3, window_bounds = array<i64: 64, 1>}, {pipeline_mode = #tpu.pipeline_mode<synchronous>, transform_indices = @transform_4, window_bounds = array<i64: 64, 1>}, {pipeline_mode = #tpu.pipeline_mode<synchronous>, transform_indices = @transform_5, window_bounds = array<i64: 64, 1>}, {pipeline_mode = #tpu.pipeline_mode<synchronous>, transform_indices = @transform_6, window_bounds = array<i64: 64, 1>}, {transform_indices = @transform_7, window_bounds = array<i64: 64, 128>}]} {
    %c0 = arith.constant 0 : index
    %c0_0 = arith.constant 0 : index
    %0 = vector.load %arg1[%c0, %c0_0] : memref<64x128xf32, #tpu.memory_space<vmem>>, vector<64x128xf32>
    %c0_1 = arith.constant 0 : index
    %c0_2 = arith.constant 0 : index
    %1 = vector.load %arg2[%c0_1, %c0_2] : memref<9x128xf32, #tpu.memory_space<vmem>>, vector<9x128xf32>
    %c0_3 = arith.constant 0 : index
    %c0_4 = arith.constant 0 : index
    %2 = vector.load %arg3[%c0_3, %c0_4] : memref<1x128xf32, #tpu.memory_space<vmem>>, vector<1x128xf32>
    %c0_5 = arith.constant 0 : index
    %c0_6 = arith.constant 0 : index
    %3 = vector.load %arg4[%c0_5, %c0_6] : memref<64x1xf32, #tpu.memory_space<vmem>>, vector<64x1xf32>
    %c0_7 = arith.constant 0 : index
    %c0_8 = arith.constant 0 : index
    %4 = vector.load %arg5[%c0_7, %c0_8] : memref<64x1xf32, #tpu.memory_space<vmem>>, vector<64x1xf32>
    %c0_9 = arith.constant 0 : index
    %c0_10 = arith.constant 0 : index
    %5 = vector.load %arg6[%c0_9, %c0_10] : memref<64x1xf32, #tpu.memory_space<vmem>>, vector<64x1xf32>
    %c0_11 = arith.constant 0 : index
    %c0_12 = arith.constant 0 : index
    %6 = vector.load %arg7[%c0_11, %c0_12] : memref<64x1xf32, #tpu.memory_space<vmem>>, vector<64x1xf32>
    %c1_i32 = arith.constant 1 : i32
    %7 = tpu.dynamic_rotate %0 by %c1_i32 dim 0 : vector<64x128xf32>, i32 -> vector<64x128xf32>
    %8 = vector.broadcast %3 : vector<64x1xf32> to vector<64x128xf32>
    %9 = arith.mulf %7, %8 : vector<64x128xf32>
    %c63_i32 = arith.constant 63 : i32
    %10 = tpu.dynamic_rotate %0 by %c63_i32 dim 0 : vector<64x128xf32>, i32 -> vector<64x128xf32>
    %11 = vector.broadcast %4 : vector<64x1xf32> to vector<64x128xf32>
    %12 = arith.mulf %10, %11 : vector<64x128xf32>
    %13 = vector.extract_strided_slice %1 {offsets = [3, 0], sizes = [1, 128], strides = [1, 1]} : vector<9x128xf32> to vector<1x128xf32>
    %14 = vector.broadcast %13 : vector<1x128xf32> to vector<64x128xf32>
    %15 = arith.mulf %9, %14 : vector<64x128xf32>
    %16 = vector.extract_strided_slice %1 {offsets = [4, 0], sizes = [1, 128], strides = [1, 1]} : vector<9x128xf32> to vector<1x128xf32>
    %17 = vector.broadcast %16 : vector<1x128xf32> to vector<64x128xf32>
    %18 = arith.mulf %0, %17 : vector<64x128xf32>
    %19 = arith.addf %15, %18 : vector<64x128xf32>
    %20 = vector.extract_strided_slice %1 {offsets = [5, 0], sizes = [1, 128], strides = [1, 1]} : vector<9x128xf32> to vector<1x128xf32>
    %21 = vector.broadcast %20 : vector<1x128xf32> to vector<64x128xf32>
    %22 = arith.mulf %12, %21 : vector<64x128xf32>
    %23 = arith.addf %19, %22 : vector<64x128xf32>
    %24 = vector.broadcast %2 : vector<1x128xf32> to vector<64x128xf32>
    %25 = arith.addf %23, %24 : vector<64x128xf32>
    %26 = vector.extract_strided_slice %1 {offsets = [0, 0], sizes = [1, 128], strides = [1, 1]} : vector<9x128xf32> to vector<1x128xf32>
    %27 = vector.broadcast %26 : vector<1x128xf32> to vector<64x128xf32>
    %28 = arith.mulf %9, %27 : vector<64x128xf32>
    %29 = vector.extract_strided_slice %1 {offsets = [1, 0], sizes = [1, 128], strides = [1, 1]} : vector<9x128xf32> to vector<1x128xf32>
    %30 = vector.broadcast %29 : vector<1x128xf32> to vector<64x128xf32>
    %31 = arith.mulf %0, %30 : vector<64x128xf32>
    %32 = arith.addf %28, %31 : vector<64x128xf32>
    %33 = vector.extract_strided_slice %1 {offsets = [2, 0], sizes = [1, 128], strides = [1, 1]} : vector<9x128xf32> to vector<1x128xf32>
    %34 = vector.broadcast %33 : vector<1x128xf32> to vector<64x128xf32>
    %35 = arith.mulf %12, %34 : vector<64x128xf32>
    %36 = arith.addf %32, %35 : vector<64x128xf32>
    %c8_i32 = arith.constant 8 : i32
    %37 = tpu.dynamic_rotate %36 by %c8_i32 dim 0 : vector<64x128xf32>, i32 -> vector<64x128xf32>
    %38 = vector.broadcast %5 : vector<64x1xf32> to vector<64x128xf32>
    %39 = arith.mulf %37, %38 : vector<64x128xf32>
    %40 = vector.extract_strided_slice %1 {offsets = [6, 0], sizes = [1, 128], strides = [1, 1]} : vector<9x128xf32> to vector<1x128xf32>
    %41 = vector.broadcast %40 : vector<1x128xf32> to vector<64x128xf32>
    %42 = arith.mulf %9, %41 : vector<64x128xf32>
    %43 = vector.extract_strided_slice %1 {offsets = [7, 0], sizes = [1, 128], strides = [1, 1]} : vector<9x128xf32> to vector<1x128xf32>
    %44 = vector.broadcast %43 : vector<1x128xf32> to vector<64x128xf32>
    %45 = arith.mulf %0, %44 : vector<64x128xf32>
    %46 = arith.addf %42, %45 : vector<64x128xf32>
    %47 = vector.extract_strided_slice %1 {offsets = [8, 0], sizes = [1, 128], strides = [1, 1]} : vector<9x128xf32> to vector<1x128xf32>
    %48 = vector.broadcast %47 : vector<1x128xf32> to vector<64x128xf32>
    %49 = arith.mulf %12, %48 : vector<64x128xf32>
    %50 = arith.addf %46, %49 : vector<64x128xf32>
    %c56_i32 = arith.constant 56 : i32
    %51 = tpu.dynamic_rotate %50 by %c56_i32 dim 0 : vector<64x128xf32>, i32 -> vector<64x128xf32>
    %52 = vector.broadcast %6 : vector<64x1xf32> to vector<64x128xf32>
    %53 = arith.mulf %51, %52 : vector<64x128xf32>
    %54 = arith.addf %25, %39 : vector<64x128xf32>
    %55 = arith.addf %54, %53 : vector<64x128xf32>
    %c0_13 = arith.constant 0 : index
    %c0_14 = arith.constant 0 : index
    %56 = vector.load %arg8[%c0_13, %c0_14] : memref<64x128xf32, #tpu.memory_space<vmem>>, vector<64x128xf32>
    tpu.vector_store %arg8[%c0_13, %c0_14], %55 {strides = array<i32>} : memref<64x128xf32, #tpu.memory_space<vmem>>, vector<64x128xf32>,
    return
  }
  func.func @transform_0(%arg0: i32) -> (i32, i32) {
    %c0_i32 = arith.constant 0 : i32
    %c0_i32_0 = arith.constant 0 : i32
    return %c0_i32, %arg0 : i32, i32
  }
  func.func @transform_1(%arg0: i32) -> (i32, i32) {
    %c0_i32 = arith.constant 0 : i32
    %c0_i32_0 = arith.constant 0 : i32
    return %c0_i32, %arg0 : i32, i32
  }
  func.func @transform_2(%arg0: i32) -> (i32, i32) {
    %c0_i32 = arith.constant 0 : i32
    %c0_i32_0 = arith.constant 0 : i32
    return %c0_i32, %arg0 : i32, i32
  }
  func.func @transform_3(%arg0: i32) -> (i32, i32) {
    %c0_i32 = arith.constant 0 : i32
    %c0_i32_0 = arith.constant 0 : i32
    %c0_i32_1 = arith.constant 0 : i32
    return %c0_i32, %c0_i32_0 : i32, i32
  }
  func.func @transform_4(%arg0: i32) -> (i32, i32) {
    %c0_i32 = arith.constant 0 : i32
    %c0_i32_0 = arith.constant 0 : i32
    %c0_i32_1 = arith.constant 0 : i32
    return %c0_i32, %c0_i32_0 : i32, i32
  }
  func.func @transform_5(%arg0: i32) -> (i32, i32) {
    %c0_i32 = arith.constant 0 : i32
    %c0_i32_0 = arith.constant 0 : i32
    %c0_i32_1 = arith.constant 0 : i32
    return %c0_i32, %c0_i32_0 : i32, i32
  }
  func.func @transform_6(%arg0: i32) -> (i32, i32) {
    %c0_i32 = arith.constant 0 : i32
    %c0_i32_0 = arith.constant 0 : i32
    %c0_i32_1 = arith.constant 0 : i32
    return %c0_i32, %c0_i32_0 : i32, i32
  }
  func.func @transform_7(%arg0: i32) -> (i32, i32) {
    %c0_i32 = arith.constant 0 : i32
    %c0_i32_0 = arith.constant 0 : i32
    return %c0_i32, %arg0 : i32, i32
  }
}

</mosaic_0001>

<bundles_post_ra>
// kernel: dwconv_pallas.1
= control target key start
LH: loop header
LB: loop body
LE: loop exit
PB: predicated region body
PF: predicated region fallthrough
CT: control target
= control target key end

     0   :  { %s1137_s24 = smov 0   ;;  %s1139_s25 = smov 0   ;;  %s1720_s0 = inlined_call_operand.vmem [shape: f32[64,256], index: 0, kind: input, shape index: {}]   ;;  %s1721_s1 = inlined_call_operand.vmem [shape: f32[9,256], index: 1, kind: input, shape index: {}]   ;;  %s1722_s2 = inlined_call_operand.vmem [shape: f32[1,256], index: 2, kind: input, shape index: {}]   ;;  %s1723_s3 = inlined_call_operand.vmem [shape: f32[64,1], index: 3, kind: input, shape index: {}]   ;;  %s1724_s4 = inlined_call_operand.vmem [shape: f32[64,1], index: 4, kind: input, shape index: {}]   ;;  %s1725_s5 = inlined_call_operand.vmem [shape: f32[64,1], index: 5, kind: input, shape index: {}]   ;;  %s1726_s6 = inlined_call_operand.vmem [shape: f32[64,1], index: 6, kind: input, shape index: {}]   ;;  %s1727_s7 = inlined_call_operand.vmem [shape: f32[64,256], index: 7, kind: output, shape index: {}]  }
   0x1   :  { %s1141_s26 = smov 0  }
   0x2 LB: > { %s1153_s27 = sadd.s32 4294967295, %s1094_s26   ;;  %s1156_s28 = sadd.s32 1, %s1094_s26   ;;  %s1094_s26 = sphi %s1141_s26, %s1746_s26   ;;  %s1090_s25 = sphi %s1139_s25, %s1745_s25   ;;  %s1086_s24 = sphi %s1137_s24, %s1744_s24  }
   0x3   : > { %s21_s29 = ssub.s32 %s1094_s26, %s1156_s28  ;;  %s24_s30 = sadd.s32 1, %s1090_s25 }
   0x4   : > { %p22_p0 = scmp.eq.s32.totalorder %s21_s29, 0  ;;  %p31_p1 = scmp.ne.s32.totalorder %s1090_s25, %s1086_s24 }
   0x5   : > { %p32_p2 = scmp.eq.s32.totalorder %s1094_s26, 0  ;;  %p197_p3 = scmp.eq.s32.totalorder %s1153_s27, 1 }
   0x6   : > { %s1166_s8 = scalar_select %p22_p0, %s1090_s25, %s24_s30  }
   0x7   : > { %p1168_p4 = por %p32_p2, %p31_p1  ;;  %p1172_p5 = por %p197_p3, %p31_p1 }
   0x8   : > { %p1030_p6 = scmp.ge.s32.totalorder %s1094_s26, 2 }
   0xa   : > { %231 = sbr.rel (%p1030_p6) target bundleno = 28 (0x1c), region = 32 }
   0xf   : > { %234 = sbr.rel (!%p1168_p4) target bundleno = 23 (0x17), region = 36  ;;  %s236_s11 = sand.u32 (%p1168_p4), 1, %s1090_s25  }
  0x10   : > { %s1032_s12 = sshll.u32 (%p1168_p4), %s1094_s26, 3  ;;  %s1031_s13 = sshll.u32 (%p1168_p4), %s236_s11, 6 }
  0x11   : > { %s240_s16 = scalar_lea.vmem (%p1168_p4), %s1720_s0, %s1032_s12  ;;  %s238_s17 = scalar_lea.vmem (%p1168_p4), [#allocation2], %s1031_s13 }
  0x12   : > { %v283_v0 = vld [vmem:[%s240_s16] sm:$0xff] (%p1168_p4)  ;;  %v285_v1 = vld [vmem:[%s240_s16 + $0x10] sm:$0xff] (%p1168_p4) }
  0x13   : > { %v287_v2 = vld [vmem:[%s240_s16 + $0x20] sm:$0xff] (%p1168_p4)  ;;  %284 = vst [vmem:[%s238_s17] sm:$0xff] (%p1168_p4), %v283_v0  ;;  %286 = vst [vmem:[%s238_s17 + $0x8] sm:$0xff] (%p1168_p4), %v285_v1  ;;  %v289_v3 = vld [vmem:[%s240_s16 + $0x30] sm:$0xff] (%p1168_p4) }
  0x14   : > { %288 = vst [vmem:[%s238_s17 + $0x10] sm:$0xff] %v287_v2  ;;  %v291_v4 = vld [vmem:[%s240_s16 + $0x40] sm:$0xff]  ;;  %v293_v5 = vld [vmem:[%s240_s16 + $0x50] sm:$0xff]  ;;  %290 = vst [vmem:[%s238_s17 + $0x18] sm:$0xff] %v289_v3 }
  0x15   : > { %292 = vst [vmem:[%s238_s17 + $0x20] sm:$0xff] %v291_v4  ;;  %294 = vst [vmem:[%s238_s17 + $0x28] sm:$0xff] %v293_v5  ;;  %v295_v6 = vld [vmem:[%s240_s16 + $0x60] sm:$0xff]  ;;  %v297_v7 = vld [vmem:[%s240_s16 + $0x70] sm:$0xff] }
  0x16   : > { %296 = vst [vmem:[%s238_s17 + $0x30] sm:$0xff] %v295_v6  ;;  %298 = vst [vmem:[%s238_s17 + $0x38] sm:$0xff] %v297_v7 }
  0x17 PF: > { %304 = sbr.rel (!%p1168_p4) target bundleno = 28 (0x1c), region = 74  ;;  %s306_s18 = sand.u32 (%p1168_p4), 1, %s1090_s25  }
  0x18   : > { %s1034_s19 = sshll.u32 (%p1168_p4), %s1094_s26, 3  ;;  %s1033_s20 = sshll.u32 (%p1168_p4), %s306_s18, 4 }
  0x19   : > { %s310_s23 = scalar_lea.vmem (%p1168_p4), %s1721_s1, %s1034_s19  ;;  %s308_s29 = scalar_lea.vmem (%p1168_p4), [#allocation3], %s1033_s20 }
  0x1a   : > { %v341_v8 = vld [vmem:[%s310_s23] sm:$0xff] (%p1168_p4)  ;;  %v343_v9 = vld [vmem:[%s310_s23 + $0x10] sm:$0xff] (%p1168_p4) }
  0x1b   : > { %342 = vst [vmem:[%s308_s29] sm:$0xff] (%p1168_p4), %v341_v8  ;;  %344 = vst [vmem:[%s308_s29 + $0x8] sm:$0xff] (%p1168_p4), %v343_v9 }
  0x1c PF: > { %p1035_p7 = scmp.ge.s32.totalorder %s1094_s26, 1  ;;  %p355_p8 = scmp.lt.s32.totalorder %s1094_s26, 3 }
  0x1e   : > { %p356_p9 = pnand %p1035_p7, %p355_p8 }
  0x20   : > { %359 = sbr.rel (%p356_p9) target bundleno = 236 (0xec), region = 116 }
  0x25   : > { %v422_v10 = vld [vmem:[%s1723_s3 + $0x10] sm:$0xff]  ;;  %v420_v11 = vld [vmem:[%s1723_s3] sm:$0xff]  ;;  %v1096_v12 = vmov 0   ;;  %v423_v13 = vld [vmem:[%s1723_s3 + $0x18] sm:$0xff]  ;;  %s362_s21 = sand.u32 1, %s1086_s24   ;;  %v460_v43 = vlaneseq  ;;  %p406_p10 = scmp.lt.s32.totalorder %s1153_s27, 1 }
  0x26   : > { %1071 = vset.pattern.permute.xlu1 %v1096_v12  ;;  %1070 = vset.pattern.permute.xlu0 %v1096_v12  ;;  %v421_v14 = vld [vmem:[%s1723_s3 + $0x8] sm:$0xff]  ;;  %v424_v16 = vld [vmem:[%s1723_s3 + $0x20] sm:$0xff]  ;;  %v427_v17 = vld [vmem:[%s1723_s3 + $0x38] sm:$0xff]  ;;  %s1290_s22 = sshll.u32 %s362_s21, 6  ;;  %s1292_s23 = sshll.u32 %s362_s21, 4 }
  0x27   : > { %483 = vperm.xlu1 %1071, %v422_v10   ;;  %473 = vperm.xlu0 %1070, %v420_v11   ;;  %v425_v15 = vld [vmem:[%s1723_s3 + $0x28] sm:$0xff]  ;;  %v426_v18 = vld [vmem:[%s1723_s3 + $0x30] sm:$0xff]  ;;  %v428_v20 = vld [vmem:[%s1724_s4] sm:$0xff]  ;;  %v1294_v44 = vshrl.u32 %v460_v43, 7  ;;  %s1302_s29 = scalar_lea.vmem [#allocation2], %s1290_s22  ;;  %s371_s24 = scalar_lea.vmem [#allocation3], %s1292_s23 }
  0x28   : > { %v429_v19 = vld [vmem:[%s1724_s4 + $0x8] sm:$0xff]  ;;  %v431_v21 = vld [vmem:[%s1724_s4 + $0x18] sm:$0xff]  ;;  %v430_v22 = vld [vmem:[%s1724_s4 + $0x10] sm:$0xff]  ;;  %s1573_s30 = scalar_select %p406_p10, %s1153_s27, 1 }
  0x29   : > { %v433_v23 = vld [vmem:[%s1724_s4 + $0x28] sm:$0xff]  ;;  %v432_v24 = vld [vmem:[%s1724_s4 + $0x20] sm:$0xff]  ;;  %v435_v25 = vld [vmem:[%s1724_s4 + $0x38] sm:$0xff]  ;;  %v598_v47 = vsub.s32 4, %v1294_v44  ;;  %vm462_vm0 = vcmp.lt.s32.totalorder %v1294_v44, 1  ;;  %v586_v54 = vsub.s32 3, %v1294_v44 }
  0x2a   : > { %v434_v26 = vld [vmem:[%s1724_s4 + $0x30] sm:$0xff]  ;;  %v437_v27 = vld [vmem:[%s1725_s5 + $0x8] sm:$0xff]  ;;  %v436_v28 = vld [vmem:[%s1725_s5] sm:$0xff]  ;;  %v652_v55 = vsub.s32 0, %v1294_v44  ;;  %v752_v56 = vsub.s32 6, %v1294_v44  ;;  %v664_v4 = vsub.s32 1, %v1294_v44  ;;  %s408_s12 = scalar_lea.vmem %s1722_s2, %s1573_s30 }
  0x2b   : > { %488 = vperm.xlu1 %1071, %v423_v13   ;;  %478 = vperm.xlu0 %1070, %v421_v14   ;;  %v439_v29 = vld [vmem:[%s1725_s5 + $0x18] sm:$0xff]  ;;  %v438_v30 = vld [vmem:[%s1725_s5 + $0x10] sm:$0xff]  ;;  %v441_v31 = vld [vmem:[%s1725_s5 + $0x28] sm:$0xff]  ;;  %v764_v5 = vsub.s32 7, %v1294_v44  ;;  %vm527_vm1 = vcmp.lt.s32.totalorder %v1294_v44, 7  ;;  %s1672_s13 = scalar_lea.vmem [#allocation4], %s1290_s22 }
  0x2c   : > { %v440_v32 = vld [vmem:[%s1725_s5 + $0x20] sm:$0xff]  ;;  %v443_v33 = vld [vmem:[%s1725_s5 + $0x38] sm:$0xff]  ;;  %v442_v34 = vld [vmem:[%s1725_s5 + $0x30] sm:$0xff]  ;;  %s1042_s14 = sshll.u32 (%p1172_p5), %s1153_s27, 3 }
  0x2d   : > { %v445_v35 = vld [vmem:[%s1726_s6 + $0x8] sm:$0xff]  ;;  %v444_v36 = vld [vmem:[%s1726_s6] sm:$0xff]  ;;  %v447_v37 = vld [vmem:[%s1726_s6 + $0x18] sm:$0xff]  ;;  %s882_s16 = scalar_lea.vmem (%p1172_p5), %s1727_s7, %s1042_s14 }
  0x2e   : > { %v446_v38 = vld [vmem:[%s1726_s6 + $0x10] sm:$0xff]  ;;  %v449_v39 = vld [vmem:[%s1726_s6 + $0x28] sm:$0xff]  ;;  %v448_v40 = vld [vmem:[%s1726_s6 + $0x20] sm:$0xff] }
  0x2f   : > { %498 = vperm.xlu1 %1071, %v425_v15   ;;  %493 = vperm.xlu0 %1070, %v424_v16   ;;  %v451_v41 = vld [vmem:[%s1726_s6 + $0x38] sm:$0xff]  ;;  %v450_v42 = vld [vmem:[%s1726_s6 + $0x30] sm:$0xff]  ;;  %v1305_v48 = vld [vmem:[%s1302_s29 + $0x8] sm:$0xff] }
  0x30   : > { %v1308_v49 = vld [vmem:[%s1302_s29 + $0x10] sm:$0xff]  ;;  %v1316_v51 = vld [vmem:[%s1302_s29] sm:$0xff]  ;;  %v1319_v52 = vld [vmem:[%s1302_s29 + $0x38] sm:$0xff]  ;;  %v453_v57 = vrot.slane %v1305_v48, 7 }
  0x31   : > { %v1313_v50 = vld [vmem:[%s371_s24] sm:$0xff]  ;;  %v1322_v53 = vld [vmem:[%s1302_s29 + $0x18] sm:$0xff]  ;;  %v454_v58 = vrot.slane %v1308_v49, 7  ;;  %v452_v63 = vrot.slane %v1316_v51, 7  ;;  %v459_v0 = vrot.slane %v1319_v52, 7  ;;  %v1342_v2 = vld [vmem:[%s1302_s29 + $0x28] sm:$0xff] }
  0x32   : > { %v1335_v61 = vld [vmem:[%s1302_s29 + $0x20] sm:$0xff]  ;;  %v599_v62 = vrot.slane %v1313_v50, %v598_v47  ;;  %v455_v1 = vrot.slane %v1322_v53, 7  ;;  %v1350_v7 = vrot.slane %v1313_v50, %v586_v54  ;;  %v1353_v8 = vrot.slane %v1313_v50, %v652_v55  ;;  %v1363_v12 = vld [vmem:[%s1302_s29 + $0x30] sm:$0xff] }
  0x33   : > { %508 = vperm.xlu1 %1071, %v427_v17   ;;  %503 = vperm.xlu0 %1070, %v426_v18   ;;  %v456_v3 = vrot.slane %v1335_v61, 7  ;;  %v468_v6 = vsel %vm462_vm0, %v453_v57, %v454_v58  ;;  %v1356_v9 = vrot.slane %v1313_v50, %v752_v56  ;;  %v470_v14 = vsel %vm462_vm0, %v459_v0, %v452_v63 }
  0x34   : > { %v1366_v13 = vmul.f32 %v599_v62, %v1308_v49  ;;  %v1371_v15 = vmul.f32 %v599_v62, %v1316_v51  ;;  %v467_v16 = vsel %vm462_vm0, %v454_v58, %v455_v1  ;;  %v1376_v17 = vmul.f32 %v599_v62, %v1322_v53 }
  0x35   : > { %v469_v18 = vsel %vm462_vm0, %v452_v63, %v453_v57  ;;  %v526_v56 = vrot.slane %v1319_v52, 1 }
  0x37   : > { %543 = vperm.xlu1 %1071, %v429_v19   ;;  %538 = vperm.xlu0 %1070, %v428_v20   ;;  %v1381_v19 = vmul.f32 %v599_v62, %v1305_v48  ;;  %v457_v20 = vrot.slane %v1342_v2, 7 }
  0x3b   : > { %553 = vperm.xlu1 %1071, %v431_v21   ;;  %548 = vperm.xlu0 %1070, %v430_v22   ;;  %v1385_v21 = vmul.f32 %v599_v62, %v1342_v2  ;;  %v1389_v22 = vsel %vm462_vm0, %v455_v1, %v456_v3 }
  0x3f   : > { %563 = vperm.xlu1 %1071, %v433_v23   ;;  %558 = vperm.xlu0 %1070, %v432_v24   ;;  %v458_v23 = vrot.slane %v1363_v12, 7 }
  0x43   : > { %573 = vperm.xlu1 %1071, %v435_v25   ;;  %568 = vperm.xlu0 %1070, %v434_v26   ;;  %v618_v26 = vsub.s32 5, %v1294_v44 }
  0x45   : > { %v1433_v47 = vrot.slane %v1313_v50, %v618_v26 }
  0x47   : > { %709 = vperm.xlu1 %1071, %v437_v27   ;;  %704 = vperm.xlu0 %1070, %v436_v28   ;;  %v520_v27 = vrot.slane %v1305_v48, 1  ;;  %v521_v28 = vrot.slane %v1308_v49, 1 }
  0x49   : > { %v1430_v43 = vsel %vm527_vm1, %v520_v27, %v521_v28 }
  0x4b   : > { %719 = vperm.xlu1 %1071, %v439_v29   ;;  %714 = vperm.xlu0 %1070, %v438_v30   ;;  %v519_v29 = vrot.slane %v1316_v51, 1  ;;  %v522_v30 = vrot.slane %v1322_v53, 1 }
  0x4d   : > { %v1439_v55 = vsel %vm527_vm1, %v519_v29, %v520_v27  ;;  %v1448_v58 = vsel %vm527_vm1, %v521_v28, %v522_v30 }
  0x4f   : > { %729 = vperm.xlu1 %1071, %v441_v31   ;;  %724 = vperm.xlu0 %1070, %v440_v32   ;;  %v523_v31 = vrot.slane %v1335_v61, 1  ;;  %v524_v32 = vrot.slane %v1342_v2, 1 }
  0x51   : > { %v1444_v57 = vsel %vm527_vm1, %v522_v30, %v523_v31  ;;  %v1456_v63 = vsel %vm527_vm1, %v523_v31, %v524_v32 }
  0x52   : > { %1731 = vst [vmem:[#allocation6_spill] sm:$0xff] %v1456_v63 }
  0x53   : > { %739 = vperm.xlu1 %1071, %v443_v33   ;;  %734 = vperm.xlu0 %1070, %v442_v34   ;;  %v525_v33 = vrot.slane %v1363_v12, 1  ;;  %v1406_v34 = vmul.f32 %v599_v62, %v1335_v61 }
  0x57   : > { %809 = vperm.xlu1 %1071, %v445_v35   ;;  %804 = vperm.xlu0 %1070, %v444_v36   ;;  %v1409_v35 = vmul.f32 %v599_v62, %v1319_v52  ;;  %v684_v36 = vsub.s32 2, %v1294_v44 }
  0x5b   : > { %819 = vperm.xlu1 %1071, %v447_v37   ;;  %814 = vperm.xlu0 %1070, %v446_v38   ;;  %v665_v37 = vrot.slane %v1313_v50, %v664_v4  ;;  %v465_v38 = vsel %vm462_vm0, %v456_v3, %v457_v20  ;;  %v1461_v3 = vrot.slane %v1313_v50, %v684_v36 }
  0x5c   : > { %v765_v4 = vrot.slane %v1313_v50, %v764_v5 }
  0x5d   : > { %v666_v1 = vmul.f32 %v665_v37, %v1316_v51  ;;  %v668_v26 = vmul.f32 %v665_v37, %v1308_v49  ;;  %v667_v27 = vmul.f32 %v665_v37, %v1305_v48  ;;  %v669_v50 = vmul.f32 %v665_v37, %v1322_v53 }
  0x5e   : > { %v1487_v31 = vmul.f32 %v665_v37, %v1363_v12  ;;  %v768_v44 = vmul.f32 %v765_v4, %v1308_v49  ;;  %v770_v36 = vmul.f32 %v765_v4, %v1335_v61 }
  0x5f   : > { %829 = vperm.xlu1 %1071, %v449_v39   ;;  %824 = vperm.xlu0 %1070, %v448_v40   ;;  %v1417_v39 = vsel %vm462_vm0, %v458_v23, %v459_v0  ;;  %v1421_v40 = vsel %vm462_vm0, %v457_v20, %v458_v23  ;;  %v1466_v23 = vmul.f32 %v665_v37, %v1319_v52 }
  0x63   : > { %839 = vperm.xlu1 %1071, %v451_v41   ;;  %834 = vperm.xlu0 %1070, %v450_v42   ;;  %v1424_v41 = vmul.f32 %v599_v62, %v1363_v12  ;;  %v1452_v62 = vsel %vm527_vm1, %v524_v32, %v525_v33  ;;  %v671_v32 = vmul.f32 %v665_v37, %v1342_v2 }
  0x64   : > { %1730 = vst [vmem:[#allocation5_spill] sm:$0xff] %v1452_v62 }
  0xa2   : > { %v1296_v45 = vpop.permute.xlu1 %483  ;;  %v1298_v46 = vpop.permute.xlu0 %473 }
  0xa3   : > { %v513_v0 = vmul.f32 %v1296_v45, %v468_v6  ;;  %v511_v20 = vmul.f32 %v1298_v46, %v470_v14  ;;  %v535_v45 = vsel %vm527_vm1, %v526_v56, %v519_v29  ;;  %v1478_v6 = vsel %vm527_vm1, %v525_v33, %v526_v56 }
  0xa4   : > { %1732 = vst [vmem:[#allocation7_spill] sm:$0xff] %v1478_v6  ;;  %v1481_v46 = vmul.f32 %v665_v37, %v1335_v61  ;;  %v767_v33 = vmul.f32 %v765_v4, %v1305_v48  ;;  %v771_v61 = vmul.f32 %v765_v4, %v1342_v2 }
  0xa5   : > { %v590_v29 = vmul.f32 %v1350_v7, %v513_v0  ;;  %v588_v56 = vmul.f32 %v1350_v7, %v511_v20  ;;  %v654_v6 = vmul.f32 %v1353_v8, %v511_v20 }
  0xa6   : > { %v1330_v59 = vpop.permute.xlu1 %488  ;;  %v1332_v60 = vpop.permute.xlu0 %478 }
  0xa7   : > { %v514_v5 = vmul.f32 %v1330_v59, %v467_v16  ;;  %v512_v14 = vmul.f32 %v1332_v60, %v469_v18  ;;  %v769_v59 = vmul.f32 %v765_v4, %v1322_v53  ;;  %v1498_v60 = vmul.f32 %v765_v4, %v1363_v12 }
  0xa8   : > { %v656_v16 = vmul.f32 %v1353_v8, %v513_v0  ;;  %v756_v18 = vmul.f32 %v1356_v9, %v513_v0  ;;  %v1511_v53 = vmul.f32 %v765_v4, %v1316_v51  ;;  %v1514_v12 = vmul.f32 %v765_v4, %v1319_v52 }
  0xa9   : > { %1733 = vst [vmem:[#allocation8_spill] sm:$0xff] %v1498_v60  ;;  %v591_v63 = vmul.f32 %v1350_v7, %v514_v5  ;;  %v589_v62 = vmul.f32 %v1350_v7, %v512_v14  ;;  %v1517_v0 = vadd.f32 %v1366_v13, %v590_v29  ;;  %v1526_v60 = vadd.f32 %v1371_v15, %v588_v56 }
  0xaa   : > { %v1358_v10 = vpop.permute.xlu1 %498  ;;  %v1360_v11 = vpop.permute.xlu0 %493  ;;  %1734 = vst [vmem:[#allocation9_spill] sm:$0xff] %v1511_v53  ;;  %1735 = vst [vmem:[#allocation10_spill] sm:$0xff] %v1514_v12  ;;  %v657_v51 = vmul.f32 %v1353_v8, %v514_v5  ;;  %v755_v52 = vmul.f32 %v1356_v9, %v512_v14  ;;  %v1530_v4 = vadd.f32 %v666_v1, %v654_v6 }
  0xab   : > { %v516_v37 = vmul.f32 %v1358_v10, %v465_v38  ;;  %v1520_v10 = vmul.f32 %v1356_v9, %v511_v20  ;;  %v655_v38 = vmul.f32 %v1353_v8, %v512_v14  ;;  %v515_v2 = vmul.f32 %v1360_v11, %v1389_v22 }
  0xac   : > { %v757_v13 = vmul.f32 %v1356_v9, %v514_v5  ;;  %v1536_v53 = vadd.f32 %v668_v26, %v656_v16  ;;  %v1541_v11 = vadd.f32 %v1376_v17, %v591_v63  ;;  %v609_v15 = vadd.f32 %v1381_v19, %v589_v62 }
  0xad   : > { %1736 = vst [vmem:[#allocation11_spill] sm:$0xff] %v1520_v10  ;;  %v593_v20 = vmul.f32 %v1350_v7, %v516_v37  ;;  %v1538_v10 = vadd.f32 %v768_v44, %v756_v18  ;;  %v659_v6 = vmul.f32 %v1353_v8, %v516_v37  ;;  %v592_v5 = vmul.f32 %v1350_v7, %v515_v2 }
  0xae   : > { %v1393_v24 = vpop.permute.xlu1 %508  ;;  %v1395_v25 = vpop.permute.xlu0 %503  ;;  %v658_v26 = vmul.f32 %v1353_v8, %v515_v2  ;;  %v675_v14 = vadd.f32 %v667_v27, %v655_v38  ;;  %v758_v17 = vmul.f32 %v1356_v9, %v515_v2  ;;  %v1555_v62 = vadd.f32 %v669_v50, %v657_v51  ;;  %v1737_v51 = vld [vmem:[#allocation5_spill] sm:$0xff] }
  0xaf   : > { %v518_v22 = vmul.f32 %v1393_v24, %v1417_v39  ;;  %v517_v1 = vmul.f32 %v1395_v25, %v1421_v40  ;;  %v775_v24 = vadd.f32 %v767_v33, %v755_v52  ;;  %v1558_v25 = vadd.f32 %v1385_v21, %v593_v20  ;;  %v1738_v20 = vld [vmem:[#allocation6_spill] sm:$0xff] }
  0xb0   : > { %v759_v39 = vmul.f32 %v1356_v9, %v516_v37  ;;  %v1563_v56 = vadd.f32 %v769_v59, %v757_v13  ;;  %v1576_v21 = vadd.f32 %v1406_v34, %v592_v5  ;;  %v1580_v50 = vadd.f32 %v1481_v46, %v658_v26 }
  0xb1   : > { %v595_v27 = vmul.f32 %v1350_v7, %v518_v22  ;;  %v661_v16 = vmul.f32 %v1353_v8, %v518_v22  ;;  %v1582_v33 = vadd.f32 %v671_v32, %v659_v6  ;;  %v1593_v34 = vadd.f32 %v770_v36, %v758_v17 }
  0xb2   : > { %v1426_v42 = vpop.permute.xlu1 %543  ;;  %v1435_v54 = vpop.permute.xlu0 %538  ;;  %v760_v46 = vmul.f32 %v1356_v9, %v517_v1  ;;  %v1601_v38 = vadd.f32 %v771_v61, %v759_v39 }
  0xb3   : > { %v577_v19 = vmul.f32 %v1426_v42, %v1430_v43  ;;  %v594_v42 = vmul.f32 %v1350_v7, %v517_v1  ;;  %v576_v43 = vmul.f32 %v1435_v54, %v1439_v55  ;;  %v1591_v55 = vld [vmem:[%s371_s24 + $0x8] ss:$0 sm:$0xff] }
  0xb5   : > { %v621_v59 = vmul.f32 %v1433_v47, %v577_v19  ;;  %v687_v36 = vmul.f32 %v1461_v3, %v577_v19  ;;  %v1633_v26 = vmul.f32 %v1591_v55, %v576_v43 }
  0xb6   : > { %v1470_v28 = vpop.permute.xlu1 %553  ;;  %v1472_v30 = vpop.permute.xlu0 %548 }
  0xb7   : > { %v579_v7 = vmul.f32 %v1470_v28, %v1444_v57  ;;  %v578_v54 = vmul.f32 %v1472_v30, %v1448_v58  ;;  %v1604_v57 = vadd.f32 %v1409_v35, %v595_v27  ;;  %v1607_v58 = vadd.f32 %v1424_v41, %v594_v42 }
  0xb8   : > { %v620_v28 = vmul.f32 %v1433_v47, %v576_v43  ;;  %v686_v30 = vmul.f32 %v1461_v3, %v576_v43  ;;  %v787_v35 = vmul.f32 %v1591_v55, %v577_v19  ;;  %v629_v13 = vadd.f32 %v621_v59, %v609_v15 }
  0xb9   : > { %v623_v41 = vmul.f32 %v1433_v47, %v579_v7  ;;  %v622_v2 = vmul.f32 %v1433_v47, %v578_v54  ;;  %v688_v19 = vmul.f32 %v1461_v3, %v578_v54  ;;  %v788_v15 = vmul.f32 %v1591_v55, %v578_v54 }
  0xba   : > { %v1503_v49 = vpop.permute.xlu1 %563  ;;  %v1505_v48 = vpop.permute.xlu0 %558  ;;  %v628_v17 = vadd.f32 %v620_v28, %v1526_v60  ;;  %v695_v39 = vadd.f32 %v687_v36, %v675_v14  ;;  %v795_v27 = vadd.f32 %v787_v35, %v775_v24 }
  0xbb   : > { %v581_v52 = vmul.f32 %v1503_v49, %v1737_v51  ;;  %v689_v49 = vmul.f32 %v1461_v3, %v579_v7  ;;  %v631_v43 = vadd.f32 %v623_v41, %v1541_v11  ;;  %v630_v60 = vadd.f32 %v622_v2, %v1517_v0 }
  0xbc   : > { %v696_v24 = vadd.f32 %v688_v19, %v1536_v53 }
  0xbd   : > { %v625_v42 = vmul.f32 %v1433_v47, %v581_v52  ;;  %v691_v0 = vmul.f32 %v1461_v3, %v581_v52  ;;  %v791_v53 = vmul.f32 %v1591_v55, %v581_v52 }
  0xbe   : > { %v574_v29 = vpop.permute.xlu1 %573  ;;  %v1534_v12 = vpop.permute.xlu0 %568 }
  0xbf   : > { %v1561_v40 = vmul.f32 %v574_v29, %v535_v45  ;;  %v660_v45 = vmul.f32 %v1353_v8, %v517_v1  ;;  %v1596_v8 = vmul.f32 %v1356_v9, %v518_v22  ;;  %v681_v9 = vadd.f32 %v1466_v23, %v661_v16  ;;  %v1627_v29 = vld [vmem:[%s408_s12] ss:$0 sm:$0xff] }
  0xc0   : > { %v580_v23 = vmul.f32 %v1505_v48, %v1738_v20  ;;  %v694_v48 = vadd.f32 %v686_v30, %v1530_v4  ;;  %v789_v16 = vmul.f32 %v1591_v55, %v579_v7  ;;  %v642_v14 = vadd.f32 %v1627_v29, %v628_v17  ;;  %v1740_v30 = vld [vmem:[#allocation7_spill] sm:$0xff] }
  0xc1   : > { %v693_v32 = vmul.f32 %v1461_v3, %v1561_v40  ;;  %v1618_v61 = vadd.f32 %v1487_v31, %v660_v45  ;;  %v1739_v31 = vld [vmem:[#allocation8_spill] sm:$0xff]  ;;  %v643_v45 = vadd.f32 %v1627_v29, %v629_v13  ;;  %v697_v7 = vadd.f32 %v689_v49, %v1555_v62 }
  0xc2   : > { %v710_v63 = vpop.permute.xlu1 %709  ;;  %v705_v44 = vpop.permute.xlu0 %704  ;;  %v1630_v5 = vadd.f32 %v1739_v31, %v760_v46  ;;  %v624_v59 = vmul.f32 %v1433_v47, %v580_v23  ;;  %v690_v54 = vmul.f32 %v1461_v3, %v580_v23  ;;  %v582_v11 = vmul.f32 %v1534_v12, %v1740_v30 }
  0xc3   : > { %v701_v22 = vadd.f32 %v693_v32, %v681_v9  ;;  %v743_v46 = vmul.f32 %v710_v63, %v694_v48  ;;  %v796_v9 = vadd.f32 %v788_v15, %v1538_v10  ;;  %v790_v63 = vmul.f32 %v1591_v55, %v580_v23 }
  0xc4   : > { %v645_v36 = vadd.f32 %v1627_v29, %v631_v43  ;;  %v644_v35 = vadd.f32 %v1627_v29, %v630_v60  ;;  %v633_v41 = vadd.f32 %v625_v42, %v1558_v25  ;;  %v698_v10 = vadd.f32 %v690_v54, %v1580_v50 }
  0xc5   : > { %v742_v32 = vmul.f32 %v705_v44, %v701_v22  ;;  %v797_v44 = vadd.f32 %v789_v16, %v1563_v56  ;;  %v851_v62 = vadd.f32 %v743_v46, %v643_v45  ;;  %v632_v12 = vadd.f32 %v624_v59, %v1576_v21 }
  0xc6   : > { %v720_v18 = vpop.permute.xlu1 %719  ;;  %v715_v37 = vpop.permute.xlu0 %714  ;;  %v627_v31 = vmul.f32 %v1433_v47, %v1561_v40  ;;  %v626_v25 = vmul.f32 %v1433_v47, %v582_v11  ;;  %v699_v52 = vadd.f32 %v691_v0, %v1582_v33  ;;  %v798_v17 = vadd.f32 %v790_v63, %v1593_v34 }
  0xc7   : > { %v850_v2 = vadd.f32 %v742_v32, %v642_v14  ;;  %v745_v20 = vmul.f32 %v720_v18, %v696_v24  ;;  %v744_v23 = vmul.f32 %v715_v37, %v695_v39  ;;  %v692_v50 = vmul.f32 %v1461_v3, %v582_v11  ;;  %v1741_v14 = vld [vmem:[#allocation11_spill] sm:$0xff]  ;;  %v1742_v24 = vld [vmem:[#allocation9_spill] sm:$0xff] }
  0xc8   : > { %v792_v49 = vmul.f32 %v1591_v55, %v582_v11  ;;  %v647_v18 = vadd.f32 %v1627_v29, %v633_v41  ;;  %v646_v34 = vadd.f32 %v1627_v29, %v632_v12 }
  0xc9   : > { %v853_v16 = vadd.f32 %v745_v20, %v645_v36  ;;  %v852_v47 = vadd.f32 %v744_v23, %v644_v35  ;;  %v700_v42 = vadd.f32 %v692_v50, %v1618_v61 }
  0xca   : > { %v730_v1 = vpop.permute.xlu1 %729  ;;  %v725_v6 = vpop.permute.xlu0 %724  ;;  %v800_v60 = vadd.f32 %v792_v49, %v1630_v5 }
  0xcb   : > { %v747_v37 = vmul.f32 %v730_v1, %v698_v10  ;;  %v746_v15 = vmul.f32 %v725_v6, %v697_v7  ;;  %v635_v1 = vadd.f32 %v627_v31, %v1604_v57  ;;  %v634_v6 = vadd.f32 %v626_v25, %v1607_v58  ;;  %v1743_v57 = vld [vmem:[#allocation10_spill] sm:$0xff] }
  0xcc   : > { %v774_v7 = vadd.f32 %v1742_v24, %v1741_v14 }
  0xcd   : > { %v855_v59 = vadd.f32 %v747_v37, %v647_v18  ;;  %v854_v46 = vadd.f32 %v746_v15, %v646_v34  ;;  %v649_v11 = vadd.f32 %v1627_v29, %v635_v1  ;;  %v648_v0 = vadd.f32 %v1627_v29, %v634_v6 }
  0xce   : > { %v740_v28 = vpop.permute.xlu1 %739  ;;  %v735_v4 = vpop.permute.xlu0 %734  ;;  %v794_v61 = vadd.f32 %v1633_v26, %v774_v7 }
  0xcf   : > { %v749_v58 = vmul.f32 %v740_v28, %v700_v42  ;;  %v748_v30 = vmul.f32 %v735_v4, %v699_v52 }
  0xd1   : > { %v857_v36 = vadd.f32 %v749_v58, %v649_v11  ;;  %v856_v4 = vadd.f32 %v748_v30, %v648_v0 }
  0xd2   : > { %v810_v51 = vpop.permute.xlu1 %809  ;;  %v805_v13 = vpop.permute.xlu0 %804 }
  0xd3   : > { %v843_v22 = vmul.f32 %v810_v51, %v796_v9  ;;  %v842_v56 = vmul.f32 %v805_v13, %v795_v27  ;;  %v799_v27 = vadd.f32 %v791_v53, %v1601_v38  ;;  %v793_v38 = vmul.f32 %v1591_v55, %v1561_v40 }
  0xd4   : > { %v781_v9 = vadd.f32 %v1743_v57, %v1596_v8 }
  0xd5   : > { %v859_v19 = vadd.f32 %v851_v62, %v843_v22  ;;  %v858_v21 = vadd.f32 %v850_v2, %v842_v56 }
  0xd6   : > { %v820_v48 = vpop.permute.xlu1 %819  ;;  %v815_v39 = vpop.permute.xlu0 %814  ;;  %v801_v5 = vadd.f32 %v793_v38, %v781_v9 }
  0xd7   : > { %867 = vst [vmem:[%s1672_s13 + $0x8] sm:$0xff] %v859_v19  ;;  %866 = vst [vmem:[%s1672_s13] sm:$0xff] %v858_v21  ;;  %v845_v3 = vmul.f32 %v820_v48, %v798_v17  ;;  %v844_v33 = vmul.f32 %v815_v39, %v797_v44 }
  0xd9   : > { %v861_v45 = vadd.f32 %v853_v16, %v845_v3  ;;  %v860_v43 = vadd.f32 %v852_v47, %v844_v33 }
  0xda   : > { %v830_v32 = vpop.permute.xlu1 %829  ;;  %v825_v54 = vpop.permute.xlu0 %824 }
  0xdb   : > { %869 = vst [vmem:[%s1672_s13 + $0x18] sm:$0xff] %v861_v45  ;;  %868 = vst [vmem:[%s1672_s13 + $0x10] sm:$0xff] %v860_v43  ;;  %v847_v40 = vmul.f32 %v830_v32, %v800_v60  ;;  %v846_v55 = vmul.f32 %v825_v54, %v799_v27 }
  0xdd   : > { %v863_v63 = vadd.f32 %v855_v59, %v847_v40  ;;  %v862_v44 = vadd.f32 %v854_v46, %v846_v55 }
  0xde   : > { %v840_v8 = vpop.permute.xlu1 %839  ;;  %v835_v28 = vpop.permute.xlu0 %834  ;;  %v925_v29 = vld [vmem:[%s1672_s13] sm:$0xff] (%p1172_p5)  ;;  %v927_v26 = vld [vmem:[%s1672_s13 + $0x8] sm:$0xff] (%p1172_p5) }
  0xdf   : > { %871 = vst [vmem:[%s1672_s13 + $0x28] sm:$0xff] %v863_v63  ;;  %870 = vst [vmem:[%s1672_s13 + $0x20] sm:$0xff] %v862_v44  ;;  %v849_v35 = vmul.f32 %v840_v8, %v794_v61  ;;  %v848_v41 = vmul.f32 %v835_v28, %v801_v5  ;;  %880 = sbr.rel (!%p1172_p5) target bundleno = 236 (0xec), region = 128 }
  0xe0   : > { %926 = vst [vmem:[%s882_s16] sm:$0xff] (%p1172_p5), %v925_v29  ;;  %928 = vst [vmem:[%s882_s16 + $0x10] sm:$0xff] (%p1172_p5), %v927_v26 }
  0xe1   : > { %v865_v53 = vadd.f32 %v857_v36, %v849_v35  ;;  %v864_v62 = vadd.f32 %v856_v4, %v848_v41 }
  0xe2   : > { %v929_v2 = vld [vmem:[%s1672_s13 + $0x10] sm:$0xff] (%p1172_p5)  ;;  %v931_v10 = vld [vmem:[%s1672_s13 + $0x18] sm:$0xff] (%p1172_p5) }
  0xe3   : > { %873 = vst [vmem:[%s1672_s13 + $0x38] sm:$0xff] %v865_v53  ;;  %872 = vst [vmem:[%s1672_s13 + $0x30] sm:$0xff] %v864_v62 }
  0xe4   : > { %930 = vst [vmem:[%s882_s16 + $0x20] sm:$0xff] %v929_v2  ;;  %932 = vst [vmem:[%s882_s16 + $0x30] sm:$0xff] %v931_v10 }
  0xe6   : > { %v933_v12 = vld [vmem:[%s1672_s13 + $0x20] sm:$0xff]  ;;  %v935_v51 = vld [vmem:[%s1672_s13 + $0x28] sm:$0xff] }
  0xe7   : > { %934 = vst [vmem:[%s882_s16 + $0x40] sm:$0xff] %v933_v12  ;;  %936 = vst [vmem:[%s882_s16 + $0x50] sm:$0xff] %v935_v51 }
  0xea   : > { %v937_v13 = vld [vmem:[%s1672_s13 + $0x30] sm:$0xff]  ;;  %v939_v20 = vld [vmem:[%s1672_s13 + $0x38] sm:$0xff] }
  0xeb   : > { %938 = vst [vmem:[%s882_s16 + $0x60] sm:$0xff] %v937_v13  ;;  %940 = vst [vmem:[%s882_s16 + $0x70] sm:$0xff] %v939_v20 }
  0xec PF: > { %p14_p11 = scmp.ge.s32.totalorder %s1156_s28, 4   ;;  %s1744_s24 = smov %s1090_s25 }
  0xed   : > { %s1745_s25 = smov %s1166_s8  ;;  %s1746_s26 = smov %s1156_s28 }
  0xee   :  { %16 = sbr.rel (!%p14_p11) target bundleno = 2 (0x2), region = 208 }

</bundles_post_ra>
